<compile_context>
chip_gen: v7x
topology: tpu7x:2x2x1
jax: 0.10.0
libtpu: 0.0.40
codegen_flags: <defaults>
</compile_context>

<pallas_src>
import jax
import jax.numpy as jnp
from jax.experimental import pallas as pl
from jax.experimental.pallas import tpu as pltpu


_INV_SQRT2 = 0.7071067811865476
_SUBLANE = {1: 32, 2: 16, 4: 8, 8: 8}   # sublane packing per itemsize


def _gelu_kernel(x_ref, o_ref):
    x = x_ref[...]
    # Exact erf-based GeLU. Compute in f32; skip casts when already f32.
    xf = x if x.dtype == jnp.float32 else x.astype(jnp.float32)
    y = xf * (0.5 * (1.0 + jax.lax.erf(xf * _INV_SQRT2)))
    o_ref[...] = y if o_ref.dtype == jnp.float32 else y.astype(o_ref.dtype)


def _to_2d(x):
    """Flatten to a lane-dense (rows, cols) slab.

    Returns (array_2d, pad) where pad is the number of trailing elements that
    were appended (0 when the element count already admits a lane-dense
    factorization)."""
    n = x.size
    flat = x.reshape(-1)
    # Prefer the widest lane-dense width (multiple of 128) that divides n.
    for c in range(2048, 127, -128):
        if n % c == 0:
            return flat.reshape(n // c, c), 0
    # No lane-dense divisor: pad by < 128 elements (negligible) so the whole
    # tensor stays on unmasked, contiguous 128-wide stores.
    pad = (-n) % 128
    flat = jnp.pad(flat, (0, pad))
    return flat.reshape((n + pad) // 128, 128), pad


def _vmem_plan():
    """Per-block byte budget and explicit scoped-VMEM limit, derived from HW."""
    try:
        info = pltpu.get_tpu_info()
        cap = int(getattr(info, "vmem_capacity_bytes", 64 << 20))
    except Exception:
        cap = 64 << 20  # conservative: v7x per-TC VMEM
    block = min(4 << 20, cap // 16)                     # ~4 MiB per block
    limit = min(cap // 2, max(6 * block, 16 << 20))     # in+out, 2x buffered + headroom
    return block, limit


def _choose_row_tile(rows, cols, itemsize, block_budget):
    """Row-tile size: ~block_budget bytes per block, sublane aligned; if the
    whole tensor fits a single block, still split rows so the parallel grid
    axis has >=4 blocks (keeps both v7x TensorCores busy)."""
    sub = _SUBLANE.get(itemsize, 8)
    max_rows = max(sub, block_budget // max(1, cols * itemsize))
    if max_rows >= rows:
        target = -(-rows // 4)                  # aim for >=4 row blocks
        tr = max(sub, -(-target // sub) * sub)  # round up to sublane multiple
    else:
        tr = max(sub, (max_rows // sub) * sub)  # round down to sublane multiple
    return min(tr, rows)


def gelu_pallas(x):
    orig_shape = x.shape
    n = x.size
    if n == 0:
        return x

    x2, pad = _to_2d(x)
    rows, cols = x2.shape
    itemsize = jnp.dtype(x2.dtype).itemsize
    block_budget, vmem_limit = _vmem_plan()
    tr = _choose_row_tile(rows, cols, itemsize, block_budget)
    grid = (pl.cdiv(rows, tr),)
    m = rows * cols

    out2 = pl.pallas_call(
        _gelu_kernel,
        out_shape=jax.ShapeDtypeStruct((rows, cols), x2.dtype),
        grid_spec=pltpu.PrefetchScalarGridSpec(
            num_scalar_prefetch=0,
            grid=grid,
            in_specs=[pl.BlockSpec((tr, cols), lambda i: (i, 0))],
            out_specs=pl.BlockSpec((tr, cols), lambda i: (i, 0)),
        ),
        compiler_params=pltpu.CompilerParams(
            dimension_semantics=("parallel",),
            vmem_limit_bytes=vmem_limit,
        ),
        cost_estimate=pl.CostEstimate(
            flops=25 * m,                 # erf polynomial + mul/add per element
            transcendentals=m,
            bytes_accessed=2 * m * itemsize,
        ),
    )(x2)

    if pad:
        return out2.reshape(-1)[:n].reshape(orig_shape)
    return out2.reshape(orig_shape)


if __name__ == "__main__":
    key = jax.random.PRNGKey(0)

    # Primary test: hidden-like shape (batch=2, seq=8, hidden=32), f32.
    x = jax.random.normal(key, (2, 8, 32), dtype=jnp.float32)
    y = jax.block_until_ready(gelu_pallas(x))
    ref = jax.nn.gelu(x, approximate=False)
    assert y.shape == x.shape and y.dtype == x.dtype
    assert jnp.allclose(y, ref, atol=1e-6, rtol=1e-6)

    # Ragged / non-128-divisible path (pad-to-128 lane-dense fallback).
    xr = jax.random.normal(jax.random.PRNGKey(1), (3, 7, 5), dtype=jnp.float32)
    yr = jax.block_until_ready(gelu_pallas(xr))
    assert yr.shape == xr.shape
    assert jnp.allclose(yr, jax.nn.gelu(xr, approximate=False), atol=1e-6, rtol=1e-6)

    # Larger multi-block path (exercises row tiling + masked boundary block).
    xl = jax.random.normal(jax.random.PRNGKey(3), (4, 100, 768), dtype=jnp.float32)
    yl = jax.block_until_ready(gelu_pallas(xl))
    assert jnp.allclose(yl, jax.nn.gelu(xl, approximate=False), atol=1e-6, rtol=1e-6)

    # bf16 I/O path (compute in f32, cast back).
    xb = jax.random.normal(jax.random.PRNGKey(2), (2, 8, 32), dtype=jnp.bfloat16)
    yb = jax.block_until_ready(gelu_pallas(xb))
    refb = jax.nn.gelu(xb.astype(jnp.float32), approximate=False).astype(jnp.bfloat16)
    assert yb.dtype == jnp.bfloat16
    assert jnp.allclose(yb.astype(jnp.float32), refb.astype(jnp.float32),
                        atol=2e-2, rtol=2e-2)

    print("KERNEL_OK")
</pallas_src>

<mosaic_0001>
module attributes {stable_mosaic.version = 11 : i64} {
  func.func @_gelu_kernel(%arg0: i32, %arg1: memref<1x512xf32, #tpu.memory_space<vmem>>, %arg2: memref<1x512xf32, #tpu.memory_space<vmem>>) attributes {dimension_semantics = [#tpu.dimension_semantics<parallel>], iteration_bounds = array<i64: 1>, scalar_prefetch = 0 : i64, scratch_operands = 0 : i64, tpu.core_type = #tpu.core_type<tc>, window_params = [{transform_indices = @transform_0, window_bounds = array<i64: 1, 512>}, {transform_indices = @transform_1, window_bounds = array<i64: 1, 512>}]} {
    %c0 = arith.constant 0 : index
    %c0_0 = arith.constant 0 : index
    %0 = vector.load %arg1[%c0, %c0_0] : memref<1x512xf32, #tpu.memory_space<vmem>>, vector<1x512xf32>
    %cst = arith.constant 0.707106769 : f32
    %1 = vector.broadcast %cst : f32 to vector<1x512xf32>
    %2 = arith.mulf %0, %1 : vector<1x512xf32>
    %3 = math.erf %2 : vector<1x512xf32>
    %cst_1 = arith.constant 1.000000e+00 : f32
    %4 = vector.broadcast %cst_1 : f32 to vector<1x512xf32>
    %5 = arith.addf %4, %3 : vector<1x512xf32>
    %cst_2 = arith.constant 5.000000e-01 : f32
    %6 = vector.broadcast %cst_2 : f32 to vector<1x512xf32>
    %7 = arith.mulf %6, %5 : vector<1x512xf32>
    %8 = arith.mulf %0, %7 : vector<1x512xf32>
    %c0_3 = arith.constant 0 : index
    %c0_4 = arith.constant 0 : index
    %9 = vector.load %arg2[%c0_3, %c0_4] : memref<1x512xf32, #tpu.memory_space<vmem>>, vector<1x512xf32>
    tpu.vector_store %arg2[%c0_3, %c0_4], %8 {strides = array<i32>} : memref<1x512xf32, #tpu.memory_space<vmem>>, vector<1x512xf32>,
    return
  }
  func.func @transform_0(%arg0: i32) -> (i32, i32) {
    %c0_i32 = arith.constant 0 : i32
    %c0_i32_0 = arith.constant 0 : i32
    return %arg0, %c0_i32 : i32, i32
  }
  func.func @transform_1(%arg0: i32) -> (i32, i32) {
    %c0_i32 = arith.constant 0 : i32
    %c0_i32_0 = arith.constant 0 : i32
    return %arg0, %c0_i32 : i32, i32
  }
}

</mosaic_0001>

<bundles_post_ra>
// kernel: tpu_custom_call.1
= control target key start
LH: loop header
LB: loop body
LE: loop exit
PB: predicated region body
PF: predicated region fallthrough
CT: control target
= control target key end

     0   :  { %6 = vsyncpa [#allocation3], 0  ;;  %s135_s0 = inlined_call_operand.hbm [shape: f32[1,512], index: 0, kind: input, shape index: {}]   ;;  %s136_s1 = inlined_call_operand.hbm [shape: f32[1,512], index: 1, kind: output, shape index: {}]  }
   0x1   :  { %7 = vsyncpa [#allocation4], 0  ;;  %s99_s6 = smov [#allocation2]   ;;  %s51_s10 = scalar_lea.hbm %s135_s0, 64 }
   0x2   :  { %s14_s7 = sshll.u32 %s99_s6, 4  ;;  %p52_p0 = scmp.ne.s32.totalorder %s135_s0, %s51_s10  ;;  %s15_s7 = int_to_ptr.vmem [resolvable:$true] %s14_s7 }
   0x3   :  { %p55_p1 = scmp.lt.u32.totalorder %s51_s10, %s135_s0 }
   0x5   :  { %p57_p2 = pnand %p55_p1, %p52_p0 }
   0x7   :  { %60 = shalt.err (!%p57_p2)
}
   0x8   :  { %s61_s15 = scalar_lea.vmem %s15_s7, 64  ;;  %p66_p4 = scmp.lt.s32.totalorder %s15_s7, %s15_s7 }
   0x9   :  { %p62_p3 = scmp.ne.s32.totalorder %s15_s7, %s61_s15  ;;  %p67_p5 = scmp.lt.s32.totalorder %s61_s15, %s61_s15 }
   0xb   :  { %p68_p6 = por %p67_p5, %p66_p4 }
   0xd   :  { %p69_p7 = pnand %p68_p6, %p62_p3 }
   0xf   :  { %72 = shalt.err (!%p69_p7)
}
  0x10   :  { %17 = dma.hbm_to_vmem [thread:$0]  %s135_s0, 64, %s15_s7, [#allocation3]  }
  0x11   :  { %95 = dma.done.wait [#allocation3], 64  }
  0x12   :  { %96 = vsyncadd [#allocation3], 4294967232  ;;  %v21_v0 = vld [vmem:[#allocation2] sm:$0xf]  ;;  %v27_v3 = vlaneseq  ;;  %s100_s18 = smov [#allocation5]  }
  0x13   :  { %v22_v1 = vmul.f32 0.70710677, %v21_v0  ;;  %s38_s19 = sshll.u32 %s100_s18, 4  ;;  %s39_s19 = int_to_ptr.vmem [resolvable:$true] %s38_s19 }
  0x14   :  { %vm29_vm0 = vcmp.lt.s32.totalorder %v27_v3, 512  ;;  %s73_s20 = scalar_lea.vmem %s39_s19, 64  ;;  %p78_p9 = scmp.lt.s32.totalorder %s39_s19, %s39_s19 }
  0x15   :  { %49 = verf.f32 %v22_v1  ;;  %p74_p8 = scmp.ne.s32.totalorder %s39_s19, %s73_s20  ;;  %p79_p10 = scmp.lt.s32.totalorder %s73_s20, %s73_s20 }
  0x17   :  { %p80_p11 = por %p79_p10, %p78_p9 }
  0x19   :  { %p81_p12 = pnand %p80_p11, %p74_p8 }
  0x1f   :  { %v50_v2 = vpop.eup %49 }
  0x20   :  { %v24_v4 = vadd.f32 1.0, %v50_v2 }
  0x22   :  { %v25_v5 = vmul.f32 0.5, %v24_v4 }
  0x24   :  { %v26_v6 = vmul.f32 %v25_v5, %v21_v0 }
  0x26   :  { %31 = vst.msk [vmem:[#allocation5] sm:$0xf] %vm29_vm0, %v26_v6 }
  0x27   :  { %84 = shalt.err (!%p81_p12)
}
  0x28   :  { %s85_s22 = scalar_lea.hbm %s136_s1, 64 }
  0x29   :  { %p86_p13 = scmp.ne.s32.totalorder %s136_s1, %s85_s22  ;;  %p89_p0 = scmp.lt.u32.totalorder %s85_s22, %s136_s1 }
  0x2b   :  { %p91_p1 = pnand %p89_p0, %p86_p13 }
  0x2d   :  { %94 = shalt.err (!%p91_p1)
}
  0x2e   :  { %41 = dma.vmem_to_hbm [thread:$0]  %s39_s19, 64, %s136_s1, [#allocation4]  }
  0x2f   :  { %97 = dma.done.wait [#allocation4], 64  }
  0x30   :  { %98 = vsyncadd [#allocation4], 4294967232 }
  0x31   :  { %45 = vsyncpa [#allocation3], 1 }
  0x32   :  { %46 = vsyncpa [#allocation4], 1 }

</bundles_post_ra>
